<compile_context>
chip_gen: v5e
topology: v5e:2x2
jax: 0.10.0
libtpu: 0.0.40
codegen_flags: <defaults>
</compile_context>

<pallas_src>
import functools

import jax
import jax.numpy as jnp
from jax.experimental import pallas as pl
from jax.experimental.pallas import tpu as pltpu


def _round_up(x, m):
    return ((x + m - 1) // m) * m


def _patch_embed_kernel(p_ref, w_ref, b_ref, o_ref):
    # (TM, K_pad) @ (K_pad, E_pad) on the MXU, f32 accumulate, + bias, cast.
    acc = jnp.dot(p_ref[...], w_ref[...], preferred_element_type=jnp.float32)
    o_ref[...] = (acc + b_ref[...]).astype(o_ref.dtype)


def _vmem_limit_bytes():
    """Scoped-VMEM limit to request (leaves ~25% of physical VMEM as headroom)."""
    try:
        cap = pltpu.get_tpu_info().vmem_capacity_bytes
    except Exception:
        cap = 64 << 20                       # conservative (v7x-sized) fallback
    return min(int(cap * 3 // 4), 96 << 20)  # v7x -> ~48 MiB, v5e/v6e -> 96 MiB


def _pick_tm(M, tm_cap):
    """Largest MXU-friendly TM <= tm_cap, preferring a TM that divides M
    (no M padding, no post-kernel slice copy)."""
    if M <= tm_cap:
        return M if M % 8 == 0 else _round_up(M, 8)
    tm_cap = max(256, (tm_cap // 256) * 256)
    for tm in range(tm_cap, 255, -256):
        if M % tm == 0:
            return tm
    return tm_cap                            # no divisor found: pad M, slice after


def patch_embed_forward(x, weight, bias, patch_size, *,
                        compute_dtype=jnp.bfloat16, out_dtype=None,
                        max_tm=4096):
    """AST PatchEmbed forward.

    x: (B, C, H, W) NCHW.  weight: (E, C, pH, pW) Conv2d weight.  bias: (E,).
    Returns (B, num_patches, E) == Conv2d(stride=patch).flatten(2).transpose(1,2).
    out_dtype: pass jnp.bfloat16 when the downstream consumer is bf16 to halve
    the output-store HBM traffic; defaults to x.dtype (PyTorch-module parity).
    """
    B, C, H, W = x.shape
    pH, pW = patch_size
    E = weight.shape[0]
    assert H % pH == 0 and W % pW == 0, "image size must divide by patch size"
    nH, nW = H // pH, W // pW
    num_patches = nH * nW
    out_dtype = x.dtype if out_dtype is None else jnp.dtype(out_dtype)

    # ---- patch extraction (pure layout glue) --------------------------------
    # (B, C, nH, pH, nW, pW) -> (B, nH, nW, C, pH, pW) -> (B*nH*nW, C*pH*pW)
    # With allow_input_fusion below (and the wrapper jitted), XLA fuses this
    # producer into the pallas_call input, so it is not materialized in HBM.
    patches = x.reshape(B, C, nH, pH, nW, pW)
    patches = patches.transpose(0, 2, 4, 1, 3, 5)
    patches = patches.reshape(B * num_patches, C * pH * pW)
    M, K = patches.shape

    # Conv2d weight (E, C, pH, pW) -> dense (K, E).
    w2d = weight.reshape(E, K).T

    # Pad K and E to multiples of 128: clean (8,128) tiles, unmasked lane-dense
    # stores, no ragged final MXU pass.  Zero padding is numerically inert.
    K_pad = _round_up(K, 128)
    E_pad = _round_up(E, 128)
    if K_pad != K:
        patches = jnp.pad(patches, ((0, 0), (0, K_pad - K)))
        w2d = jnp.pad(w2d, ((0, K_pad - K), (0, 0)))
    if E_pad != E:
        w2d = jnp.pad(w2d, ((0, 0), (0, E_pad - E)))
        b2d = jnp.pad(bias, (0, E_pad - E)).reshape(1, E_pad)
    else:
        b2d = bias.reshape(1, E_pad)

    # Feed the MXU bf16 (accumulation stays f32 inside the kernel).
    patches = patches.astype(compute_dtype)
    w2d = w2d.astype(compute_dtype)
    b2d = b2d.astype(jnp.float32)

    in_bytes = jnp.dtype(compute_dtype).itemsize
    out_bytes = jnp.dtype(out_dtype).itemsize

    # ---- tile size / VMEM budgeting ------------------------------------------
    vmem_limit = _vmem_limit_bytes()
    # Resident blocks (weight/bias, constant index_map). Pallas only DMAs them
    # once, but budget both pipeline buffers; single-buffering via
    # pl.Buffered(1) would only reclaim this ~K_pad*E_pad*in_bytes of VMEM.
    resident = 2 * K_pad * E_pad * in_bytes + 2 * E_pad * 4
    # Streamed blocks, double-buffered, per output row.
    per_row = 2 * K_pad * in_bytes + 2 * E_pad * out_bytes
    budget = max(vmem_limit - resident - (2 << 20), per_row * 256)
    tm_cap = min(max_tm, max(256, budget // per_row))
    TM = _pick_tm(M, tm_cap)

    M_pad = _round_up(M, TM)
    if M_pad != M:
        patches = jnp.pad(patches, ((0, M_pad - M), (0, 0)))
    grid = (M_pad // TM,)

    est_usage = resident + TM * per_row + (2 << 20)
    vmem_limit = int(max(vmem_limit, est_usage))

    cost = pl.CostEstimate(
        flops=2 * M_pad * K_pad * E_pad,
        transcendentals=0,
        bytes_accessed=(M_pad * K_pad * in_bytes       # patches (fused producer)
                        + K_pad * E_pad * in_bytes     # weight
                        + E_pad * 4                    # bias
                        + M_pad * E_pad * out_bytes),  # output
    )

    out = pl.pallas_call(
        _patch_embed_kernel,
        out_shape=jax.ShapeDtypeStruct((M_pad, E_pad), out_dtype),
        grid=grid,
        in_specs=[
            pl.BlockSpec((TM, K_pad), lambda i: (i, 0)),     # patches: streamed over M
            pl.BlockSpec((K_pad, E_pad), lambda i: (0, 0)),  # weight : resident in VMEM
            pl.BlockSpec((1, E_pad), lambda i: (0, 0)),      # bias   : resident in VMEM
        ],
        out_specs=pl.BlockSpec((TM, E_pad), lambda i: (i, 0)),
        compiler_params=pltpu.CompilerParams(
            # "parallel" lets v7x shard the M axis over both TensorCores.
            # TODO(synk): if xprof shows one v7x TC idle, switch this axis to
            # pltpu.CORE_PARALLEL (or an explicit core_map).
            dimension_semantics=("parallel",),
            vmem_limit_bytes=vmem_limit,
            # Allow XLA to fuse the reshape/transpose/astype/pad producer of
            # `patches` (operand 0) into this call -> no HBM round-trip for
            # the (M, K) intermediate.
            allow_input_fusion=[True, False, False],
        ),
        cost_estimate=cost,
    )(patches, w2d, b2d)

    # Drop padding (no-op when TM divides M and E % 128 == 0), restore
    # (B, num_patches, E) == flatten(2).transpose(1, 2).
    if M_pad != M or E_pad != E:
        out = out[:M, :E]
    return out.reshape(B, num_patches, E)


if __name__ == "__main__":
    # Small config consistent with the module: img=16, patch=8, C=4, E=32, B=2.
    B, C, H, W = 2, 4, 16, 16
    pH, pW = 8, 8
    E = 32

    key = jax.random.PRNGKey(0)
    kx, kw, kb = jax.random.split(key, 3)
    x = jax.random.normal(kx, (B, C, H, W), dtype=jnp.float32)
    weight = jax.random.normal(kw, (E, C, pH, pW), dtype=jnp.float32) * 0.02
    bias = jax.random.normal(kb, (E,), dtype=jnp.float32) * 0.02

    # jit the wrapper so allow_input_fusion can actually fuse the patch
    # extraction into the pallas_call.
    fwd = jax.jit(functools.partial(patch_embed_forward, patch_size=(pH, pW)))
    out = jax.block_until_ready(fwd(x, weight, bias))

    # Reference in f32 (kernel matmul runs bf16 with f32 accumulation, so it
    # is not bit-identical to a pure-f32 PyTorch Conv2d).
    nH, nW = H // pH, W // pW
    patches_ref = (
        x.reshape(B, C, nH, pH, nW, pW)
        .transpose(0, 2, 4, 1, 3, 5)
        .reshape(B * nH * nW, C * pH * pW)
    )
    ref = (patches_ref @ weight.reshape(E, -1).T + bias).reshape(B, nH * nW, E)
    assert out.shape == (B, nH * nW, E), out.shape
    assert out.dtype == x.dtype, out.dtype
    assert jnp.allclose(out, ref, atol=2e-2, rtol=2e-2)

    print("KERNEL_OK")
</pallas_src>

<mosaic_0001>
module attributes {stable_mosaic.version = 11 : i64} {
  func.func @_patch_embed_kernel(%arg0: i32, %arg1: memref<8x256xbf16, #tpu.memory_space<vmem>>, %arg2: memref<256x128xbf16, #tpu.memory_space<vmem>>, %arg3: memref<1x128xf32, #tpu.memory_space<vmem>>, %arg4: memref<8x128xf32, #tpu.memory_space<vmem>>) attributes {dimension_semantics = [#tpu.dimension_semantics<parallel>], iteration_bounds = array<i64: 1>, scalar_prefetch = 0 : i64, scratch_operands = 0 : i64, tpu.core_type = #tpu.core_type<tc>, window_params = [{transform_indices = @transform_0, window_bounds = array<i64: 8, 256>}, {pipeline_mode = #tpu.pipeline_mode<synchronous>, transform_indices = @transform_1, window_bounds = array<i64: 256, 128>}, {pipeline_mode = #tpu.pipeline_mode<synchronous>, transform_indices = @transform_2, window_bounds = array<i64: 1, 128>}, {transform_indices = @transform_3, window_bounds = array<i64: 8, 128>}]} {
    %c0 = arith.constant 0 : index
    %c0_0 = arith.constant 0 : index
    %0 = vector.load %arg1[%c0, %c0_0] : memref<8x256xbf16, #tpu.memory_space<vmem>>, vector<8x256xbf16>
    %c0_1 = arith.constant 0 : index
    %c0_2 = arith.constant 0 : index
    %1 = vector.load %arg2[%c0_1, %c0_2] : memref<256x128xbf16, #tpu.memory_space<vmem>>, vector<256x128xbf16>
    %cst = arith.constant dense<0.000000e+00> : vector<8x128xf32>
    %2 = tpu.matmul %0, %1, %cst {dimension_numbers = #tpu.dot_dimension_numbers<[1], [0], [0], [1], [0, 0, 1, 1], [], []>} : vector<8x256xbf16>, vector<256x128xbf16>, vector<8x128xf32> -> vector<8x128xf32>
    %c0_3 = arith.constant 0 : index
    %c0_4 = arith.constant 0 : index
    %3 = vector.load %arg3[%c0_3, %c0_4] : memref<1x128xf32, #tpu.memory_space<vmem>>, vector<1x128xf32>
    %4 = vector.broadcast %3 : vector<1x128xf32> to vector<8x128xf32>
    %5 = arith.addf %2, %4 : vector<8x128xf32>
    %c0_5 = arith.constant 0 : index
    %c0_6 = arith.constant 0 : index
    %6 = vector.load %arg4[%c0_5, %c0_6] : memref<8x128xf32, #tpu.memory_space<vmem>>, vector<8x128xf32>
    tpu.vector_store %arg4[%c0_5, %c0_6], %5 {strides = array<i32>} : memref<8x128xf32, #tpu.memory_space<vmem>>, vector<8x128xf32>,
    return
  }
  func.func @transform_0(%arg0: i32) -> (i32, i32) {
    %c0_i32 = arith.constant 0 : i32
    %c0_i32_0 = arith.constant 0 : i32
    return %arg0, %c0_i32 : i32, i32
  }
  func.func @transform_1(%arg0: i32) -> (i32, i32) {
    %c0_i32 = arith.constant 0 : i32
    %c0_i32_0 = arith.constant 0 : i32
    %c0_i32_1 = arith.constant 0 : i32
    return %c0_i32, %c0_i32_0 : i32, i32
  }
  func.func @transform_2(%arg0: i32) -> (i32, i32) {
    %c0_i32 = arith.constant 0 : i32
    %c0_i32_0 = arith.constant 0 : i32
    %c0_i32_1 = arith.constant 0 : i32
    return %c0_i32, %c0_i32_0 : i32, i32
  }
  func.func @transform_3(%arg0: i32) -> (i32, i32) {
    %c0_i32 = arith.constant 0 : i32
    %c0_i32_0 = arith.constant 0 : i32
    return %arg0, %c0_i32 : i32, i32
  }
}

</mosaic_0001>

<bundles_post_ra>
// kernel: patch_embed_forward.1
= control target key start
LH: loop header
LB: loop body
LE: loop exit
PB: predicated region body
PF: predicated region fallthrough
CT: control target
= control target key end

     0   :  { %s384_s0 = inlined_call_operand.vmem [shape: bf16[8,256], index: 0, kind: input, shape index: {}]   ;;  %s385_s1 = inlined_call_operand.vmem [shape: bf16[256,128], index: 1, kind: input, shape index: {}]   ;;  %s386_s2 = inlined_call_operand.vmem [shape: f32[1,128], index: 2, kind: input, shape index: {}]   ;;  %s387_s3 = inlined_call_operand.hbm [shape: f32[8,128], index: 3, kind: output, shape index: {}]  }
   0x1   :  { %v269_v0 = vld [vmem:[%s385_s1 + $0x38] sm:$0xff]  ;;  %v268_v2 = vld [vmem:[%s385_s1 + $0x30] sm:$0xff]  ;;  %v267_v4 = vld [vmem:[%s385_s1 + $0x28] sm:$0xff] }
   0x2   :  { %v277_v1 = vld [vmem:[%s385_s1 + $0x78] sm:$0xff]  ;;  %155 = vmatpush.bf16.msra.mxu0 %v269_v0  ;;  %v276_v3 = vld [vmem:[%s385_s1 + $0x70] sm:$0xff]  ;;  %v275_v5 = vld [vmem:[%s385_s1 + $0x68] sm:$0xff] }
   0x3   :  { %168 = vmatpush.bf16.msra.mxu1 %v277_v1 }
   0x6   :  { %156 = vmatpush.bf16.msra.mxu0 %v268_v2 }
   0x7   :  { %169 = vmatpush.bf16.msra.mxu1 %v276_v3 }
   0x8   :  { %8 = vsyncpa [#allocation3], 0  ;;  %v266_v6 = vld [vmem:[%s385_s1 + $0x20] sm:$0xff]  ;;  %v265_v8 = vld [vmem:[%s385_s1 + $0x18] sm:$0xff]  ;;  %s306_s20 = smov [#allocation2]   ;;  %s189_s24 = sshll.u32 %s387_s3, 4  ;;  %s190_s24 = int_to_ptr.hbm [resolvable:$true] %s189_s24 }
   0x9   :  { %v274_v7 = vld [vmem:[%s385_s1 + $0x60] sm:$0xff]  ;;  %v273_v9 = vld [vmem:[%s385_s1 + $0x58] sm:$0xff]  ;;  %v264_v10 = vld [vmem:[%s385_s1 + $0x10] sm:$0xff]  ;;  %s187_s21 = sshll.u32 %s306_s20, 4  ;;  %s188_s21 = int_to_ptr.vmem [resolvable:$true] %s187_s21 }
   0xa   :  { %157 = vmatpush.bf16.msra.mxu0 %v267_v4  ;;  %v272_v11 = vld [vmem:[%s385_s1 + $0x50] sm:$0xff]  ;;  %v263_v12 = vld [vmem:[%s385_s1 + $0x8] sm:$0xff]  ;;  %v15_v14 = vld [vmem:[%s384_s0] sm:$0xff] }
   0xb   :  { %170 = vmatpush.bf16.msra.mxu1 %v275_v5  ;;  %v271_v13 = vld [vmem:[%s385_s1 + $0x48] sm:$0xff]  ;;  %v53_v15 = vunpack.c.l.b16 %v15_v14  ;;  %v54_v16 = vunpack.c.h.b16 %v15_v14  ;;  %v262_v17 = vld [vmem:[%s385_s1] sm:$0xff] }
   0xc   :  { %v270_v18 = vld [vmem:[%s385_s1 + $0x40] sm:$0xff] }
   0xd   :  { %v55_v19 = vpack.c.b16 %v53_v15, %v53_v15  ;;  %v56_v20 = vpack.c.b16 %v54_v16, %v54_v16  ;;  %v279_v21 = vld [vmem:[%s386_s2] ss:$0 sm:$0xff] }
   0xe   :  { %158 = vmatpush.bf16.msra.mxu0 %v266_v6 }
   0xf   :  { %171 = vmatpush.bf16.msra.mxu1 %v274_v7 }
  0x12   :  { %159 = vmatpush.bf16.msra.mxu0 %v265_v8 }
  0x13   :  { %172 = vmatpush.bf16.msra.mxu1 %v273_v9 }
  0x16   :  { %160 = vmatpush.bf16.msra.mxu0 %v264_v10 }
  0x17   :  { %173 = vmatpush.bf16.msra.mxu1 %v272_v11 }
  0x1a   :  { %161 = vmatpush.bf16.msra.mxu0 %v263_v12 }
  0x1b   :  { %174 = vmatpush.bf16.msra.mxu1 %v271_v13 }
  0x1e   :  { %162 = vmatpush.bf16.msra.mxu0 %v262_v17 }
  0x1f   :  { %175 = vmatpush.bf16.msra.mxu1 %v270_v18 }
  0x21   :  { %163 = vmatmul.bf16.vlgmr.msra.gmra.mxu0 %v55_v19 }
  0x22   :  { %176 = vmatmul.bf16.vlgmr.msra.gmra.mxu1 %v56_v20 }
  0x9e   :  { %v164_v22 = vpop.f32.mrf.mxu0 }
  0x9f   :  { %v177_v23 = vpop.f32.mrf.mxu1  ;;  %v165_v24 = vadd.f32 %v279_v21, %v164_v22 }
  0xa1   :  { %v178_v25 = vadd.f32 %v177_v23, %v165_v24 }
  0xa3   :  { %181 = vst [vmem:[#allocation2] sm:$0xff] %v178_v25 }
  0xa4   :  { %192 = dma.vmem_to_hbm [thread:$0]  %s188_s21, 128, %s190_s24, [#allocation3]  }
  0xa6   :  { %v166_v26 = vpop.f32.mrf.mxu0 }
  0xa7   :  { %v179_v27 = vpop.f32.mrf.mxu1 }
  0xa8   :  { %304 = dma.done.wait [#allocation3], 128  }
  0xa9   :  { %305 = vsyncadd [#allocation3], 4294967168 }
  0xaa   :  { %197 = vsyncpa [#allocation3], 1 }

</bundles_post_ra>
